<compile_context>
chip_gen: v7x
topology: tpu7x:2x2x1
jax: 0.10.0
libtpu: 0.0.40
codegen_flags: <defaults>
</compile_context>

<pallas_src>
import functools

import jax
import jax.numpy as jnp
from jax.experimental import pallas as pl
from jax.experimental.pallas import tpu as pltpu

LANE = 128


def _round_up(n, m):
    return ((n + m - 1) // m) * m


def _pad2d(a, rows, cols):
    out = jnp.zeros((rows, cols), a.dtype)
    return out.at[: a.shape[0], : a.shape[1]].set(a)


# ------------------------- Pallas kernel (hot path) -------------------------

def _mvae_surv_kernel(x_ref, w1_ref, b_enc_ref, w_mus1_ref, b_mus1_ref,
                      w_s2_ref, b_s2_ref, phi_ref, *,
                      n_cat, n_cont, cat_offsets, cont_base, v_pad,
                      num_durations):
    x = x_ref[...]                                            # (TB, n_in) f32
    tb = x.shape[0]

    # ---- layer-1 feature vector: cat one-hots + raw cont lanes, ONE matmul ----
    lane = jax.lax.broadcasted_iota(jnp.int32, (tb, v_pad), 1)

    # cat one-hots over disjoint vocab ranges: boolean compare + OR, single cast
    # at the end.  float -> int truncation mirrors x_cat.long().  Out-of-range /
    # garbage codes (incl. ragged-last-tile rows) miss every lane or hit a wrong
    # one; PyTorch's embedding would raise instead — behavioral, not numeric.
    hit = lane == (x[:, 0:1].astype(jnp.int32) + cat_offsets[0])
    for i in range(1, n_cat):                                 # static, tiny unroll
        hit = hit | (lane == (x[:, i:i + 1].astype(jnp.int32) + cat_offsets[i]))
    feat = hit.astype(jnp.float32)

    # scatter the raw cont values into their reserved (static) lanes; this folds
    # the old x @ W_x matmul + partial-sum add into the single matmul below.
    for j in range(n_cont):                                   # static, tiny unroll
        feat = jnp.where(lane == cont_base + j,
                         x[:, n_cat + j:n_cat + j + 1], feat)

    h = jnp.dot(feat.astype(jnp.bfloat16), w1_ref[...],
                preferred_element_type=jnp.float32)
    h = jnp.maximum(h + b_enc_ref[...], 0.0)                  # f32 elementwise

    # ---- fused mu -> s1 (no nonlinearity in between; folded offline) ----
    s = jnp.dot(h.astype(jnp.bfloat16), w_mus1_ref[...],
                preferred_element_type=jnp.float32) + b_mus1_ref[...]
    s = jnp.maximum(s, 0.0)

    # ---- surv logits: compute on padded lanes, store only num_durations ----
    phi = jnp.dot(s.astype(jnp.bfloat16), w_s2_ref[...],
                  preferred_element_type=jnp.float32) + b_s2_ref[...]
    phi_ref[...] = phi[:, :num_durations].astype(phi_ref.dtype)


def mvae_surv_pallas(x, params, *, n_cat, n_cont, cat_offsets, cont_base,
                     num_durations, tile_b=None):
    """x: (B, n_cat + n_cont) raw flat input. Returns phi (B, num_durations) f32."""
    B, n_in = x.shape
    v_pad = params["w1"].shape[0]

    if tile_b is None:
        # ~1024-2048 rows/step amortizes the ~0.35us fixed per-step pipeline cost,
        # but keep >= ~8 grid steps so v7x's two TensorCores both get work on the
        # "parallel" batch axis.  Always a multiple of 8.
        b8 = _round_up(B, 8)
        cap = max(256, _round_up(max(B // 8, 1), 8))
        tile_b = max(8, min(2048, cap, b8))
    grid = (pl.cdiv(B, tile_b),)

    batch_map = lambda i: (i, 0)
    const_map = lambda i: (0, 0)        # weights stay VMEM-resident across steps

    kernel = functools.partial(
        _mvae_surv_kernel, n_cat=n_cat, n_cont=n_cont,
        cat_offsets=tuple(int(o) for o in cat_offsets),
        cont_base=int(cont_base), v_pad=v_pad, num_durations=num_durations)

    weight_names = ("w1", "b_enc", "w_mus1", "b_mus1", "w_s2", "b_s2")
    weights = [params[k] for k in weight_names]

    m1, m2, m3 = params["w1"].shape, params["w_mus1"].shape, params["w_s2"].shape
    flops = 2 * B * (m1[0] * m1[1] + m2[0] * m2[1] + m3[0] * m3[1])
    bytes_accessed = int(x.size * x.dtype.itemsize
                         + B * num_durations * 4
                         + sum(w.size * w.dtype.itemsize for w in weights))

    return pl.pallas_call(
        kernel,
        out_shape=jax.ShapeDtypeStruct((B, num_durations), jnp.float32),
        grid=grid,
        in_specs=[pl.BlockSpec((tile_b, n_in), batch_map)]
                 + [pl.BlockSpec(w.shape, const_map) for w in weights],
        out_specs=pl.BlockSpec((tile_b, num_durations), batch_map),
        compiler_params=pltpu.CompilerParams(
            dimension_semantics=("parallel",),      # megacore batch split on v7x
            vmem_limit_bytes=32 * 1024 * 1024,      # v5e default 16 MiB; v7x only
        ),                                          # has 64 MiB physical — don't raise
        cost_estimate=pl.CostEstimate(flops=flops, transcendentals=0,
                                      bytes_accessed=bytes_accessed),
    )(x, *weights)


# ----------------------------- JAX glue (module) -----------------------------

class SurvFromMVAEPallas:
    """JAX/Pallas re-implementation of SurvFromMVAE.predict (returns phi)."""

    def __init__(self, n_cat, cat_vocab_sizes, emb_dim, n_cont,
                 enc_hidden, latent_dim, surv_hidden, num_durations, key):
        assert n_cat >= 1 and len(cat_vocab_sizes) == n_cat
        self.n_cat = n_cat
        self.n_cont = n_cont
        self.num_durations = num_durations
        feat_dim = n_cat * emb_dim + n_cont

        keys = jax.random.split(key, n_cat + 8)
        # deterministic synthetic MVAE parameters (mvae_net is external; no
        # checkpoint loading here)
        self.emb_tables = [
            0.3 * jax.random.normal(keys[i], (v, emb_dim), jnp.float32)
            for i, v in enumerate(cat_vocab_sizes)
        ]
        k = n_cat
        self.w_enc = 0.3 * jax.random.normal(keys[k + 0], (feat_dim, enc_hidden), jnp.float32)
        self.b_enc = 0.1 * jax.random.normal(keys[k + 1], (1, enc_hidden), jnp.float32)
        self.w_mu = 0.3 * jax.random.normal(keys[k + 2], (enc_hidden, latent_dim), jnp.float32)
        self.b_mu = 0.1 * jax.random.normal(keys[k + 3], (1, latent_dim), jnp.float32)
        self.w_s1 = 0.3 * jax.random.normal(keys[k + 4], (latent_dim, surv_hidden), jnp.float32)
        self.b_s1 = 0.1 * jax.random.normal(keys[k + 5], (1, surv_hidden), jnp.float32)
        self.w_s2 = 0.3 * jax.random.normal(keys[k + 6], (surv_hidden, num_durations), jnp.float32)
        self.b_s2 = 0.1 * jax.random.normal(keys[k + 7], (1, num_durations), jnp.float32)

        # -------- fold / pad / cast the parameters for the kernel ----------
        hp = jax.lax.Precision.HIGHEST
        offsets, off = [], 0
        for v in cat_vocab_sizes:
            offsets.append(off)
            off += v
        total_vocab = off
        self.cat_offsets = tuple(offsets)        # one-hot lane offsets per table
        self.cont_base = total_vocab             # cont values live in spare lanes

        # embedding gather folded into the encoder matmul:
        #   W1[offset_i + c, :]   = E_i[c, :] @ W_enc[i*emb_dim:(i+1)*emb_dim, :]
        #   W1[total_vocab + j,:] = W_enc[n_cat*emb_dim + j, :]   (cont rows)
        w_cat = jnp.concatenate(
            [jnp.dot(self.emb_tables[i],
                     self.w_enc[i * emb_dim:(i + 1) * emb_dim, :], precision=hp)
             for i in range(n_cat)], axis=0)                      # (total_vocab, enc_hidden)
        w1 = jnp.concatenate([w_cat, self.w_enc[n_cat * emb_dim:, :]], axis=0)

        # mu -> s1: no nonlinearity in between, fold into one matmul
        w_mus1 = jnp.dot(self.w_mu, self.w_s1, precision=hp)      # (enc_hidden, surv_hidden)
        b_mus1 = jnp.dot(self.b_mu, self.w_s1, precision=hp) + self.b_s1

        v_pad = _round_up(total_vocab + n_cont, LANE)
        h_pad = _round_up(enc_hidden, LANE)
        s_pad = _round_up(surv_hidden, LANE)
        d_pad = _round_up(num_durations, LANE)

        bf16 = jnp.bfloat16
        self.kernel_params = {
            # matmul weights in bf16 (MXU-native, half the DMA); biases stay f32
            "w1": _pad2d(w1, v_pad, h_pad).astype(bf16),
            "b_enc": _pad2d(self.b_enc, 1, h_pad),
            "w_mus1": _pad2d(w_mus1, h_pad, s_pad).astype(bf16),
            "b_mus1": _pad2d(b_mus1, 1, s_pad),
            "w_s2": _pad2d(self.w_s2, s_pad, d_pad).astype(bf16),
            "b_s2": _pad2d(self.b_s2, 1, d_pad),
        }

    def predict(self, x):
        # The [cat | cont] split, .long() cast, the embedding gather and the
        # feature concat all happen inside the kernel -> raw x goes in, and the
        # kernel writes phi at its exact (B, num_durations) shape.
        return mvae_surv_pallas(x.astype(jnp.float32), self.kernel_params,
                                n_cat=self.n_cat, n_cont=self.n_cont,
                                cat_offsets=self.cat_offsets,
                                cont_base=self.cont_base,
                                num_durations=self.num_durations)

    # forward() in the PyTorch module returns the full mvae_net output tuple;
    # TODO(synk): only the TEST_MODE surv head (phi) is implemented; the
    # recon / KL decoders of the MVAE are not part of this predict hot path.
    def __call__(self, x):
        return self.predict(x)


# ---------------------------------- demo ------------------------------------

if __name__ == "__main__":
    key = jax.random.PRNGKey(0)
    k_cat, k_cont, k_params = jax.random.split(key, 3)

    # small, module-consistent shapes
    B = 8
    n_cat, n_cont = 3, 5
    cat_vocab_sizes = [5, 7, 4]
    emb_dim = 4
    enc_hidden = 32
    latent_dim = 16
    surv_hidden = 32
    num_durations = 20

    # flat input x = [cat, ..., cat, cont, ..., cont] (cat codes stored as floats)
    cat_cols = jnp.stack(
        [jax.random.randint(jax.random.fold_in(k_cat, i), (B,), 0, v)
         for i, v in enumerate(cat_vocab_sizes)], axis=1).astype(jnp.float32)
    cont_cols = jax.random.normal(k_cont, (B, n_cont), jnp.float32)
    x = jnp.concatenate([cat_cols, cont_cols], axis=1)   # (B, n_cat + n_cont)

    model = SurvFromMVAEPallas(n_cat, cat_vocab_sizes, emb_dim, n_cont,
                               enc_hidden, latent_dim, surv_hidden,
                               num_durations, k_params)

    phi = model.predict(x)
    jax.block_until_ready(phi)

    # plain-JAX f32 reference of the original (unfolded, gather-based) surv path
    hp = jax.lax.Precision.HIGHEST
    x_cat = x[:, :n_cat].astype(jnp.int32)
    x_cont = x[:, n_cat:]
    embs = [jnp.take(t, x_cat[:, i], axis=0) for i, t in enumerate(model.emb_tables)]
    feats = jnp.concatenate(embs + [x_cont], axis=-1)
    h = jnp.maximum(jnp.dot(feats, model.w_enc, precision=hp) + model.b_enc, 0.0)
    z = jnp.dot(h, model.w_mu, precision=hp) + model.b_mu
    s = jnp.maximum(jnp.dot(z, model.w_s1, precision=hp) + model.b_s1, 0.0)
    phi_ref = jnp.dot(s, model.w_s2, precision=hp) + model.b_s2

    assert phi.shape == (B, num_durations), phi.shape
    # make sure the check is non-degenerate (phi is not trivially ~0)
    assert float(jnp.max(jnp.abs(phi_ref))) > 0.2
    # bf16 weights/activations in the kernel vs full-f32 reference
    assert jnp.allclose(phi, phi_ref, atol=5e-2, rtol=5e-2), (
        float(jnp.max(jnp.abs(phi - phi_ref))))

    print("KERNEL_OK")
</pallas_src>

<mosaic_0001>
module attributes {stable_mosaic.version = 11 : i64} {
  func.func @_mvae_surv_kernel(%arg0: i32, %arg1: memref<8x8xf32, #tpu.memory_space<vmem>>, %arg2: memref<128x128xbf16, #tpu.memory_space<vmem>>, %arg3: memref<1x128xf32, #tpu.memory_space<vmem>>, %arg4: memref<128x128xbf16, #tpu.memory_space<vmem>>, %arg5: memref<1x128xf32, #tpu.memory_space<vmem>>, %arg6: memref<128x128xbf16, #tpu.memory_space<vmem>>, %arg7: memref<1x128xf32, #tpu.memory_space<vmem>>, %arg8: memref<8x20xf32, #tpu.memory_space<vmem>>) attributes {dimension_semantics = [#tpu.dimension_semantics<parallel>], iteration_bounds = array<i64: 1>, scalar_prefetch = 0 : i64, scratch_operands = 0 : i64, tpu.core_type = #tpu.core_type<tc>, window_params = [{transform_indices = @transform_0, window_bounds = array<i64: 8, 8>}, {pipeline_mode = #tpu.pipeline_mode<synchronous>, transform_indices = @transform_1, window_bounds = array<i64: 128, 128>}, {pipeline_mode = #tpu.pipeline_mode<synchronous>, transform_indices = @transform_2, window_bounds = array<i64: 1, 128>}, {pipeline_mode = #tpu.pipeline_mode<synchronous>, transform_indices = @transform_3, window_bounds = array<i64: 128, 128>}, {pipeline_mode = #tpu.pipeline_mode<synchronous>, transform_indices = @transform_4, window_bounds = array<i64: 1, 128>}, {pipeline_mode = #tpu.pipeline_mode<synchronous>, transform_indices = @transform_5, window_bounds = array<i64: 128, 128>}, {pipeline_mode = #tpu.pipeline_mode<synchronous>, transform_indices = @transform_6, window_bounds = array<i64: 1, 128>}, {transform_indices = @transform_7, window_bounds = array<i64: 8, 20>}]} {
    %c0 = arith.constant 0 : index
    %c0_0 = arith.constant 0 : index
    %0 = vector.load %arg1[%c0, %c0_0] : memref<8x8xf32, #tpu.memory_space<vmem>>, vector<8x8xf32>
    %1 = tpu.iota {dimensions = array<i32: 1>} : vector<8x128xi32>
    %2 = vector.extract_strided_slice %0 {offsets = [0, 0], sizes = [8, 1], strides = [1, 1]} : vector<8x8xf32> to vector<8x1xf32>
    %3 = arith.fptosi %2 : vector<8x1xf32> to vector<8x1xi32>
    %c0_i32 = arith.constant 0 : i32
    %4 = vector.broadcast %c0_i32 : i32 to vector<8x1xi32>
    %5 = arith.addi %3, %4 : vector<8x1xi32>
    %6 = vector.broadcast %5 : vector<8x1xi32> to vector<8x128xi32>
    %7 = arith.cmpi eq, %1, %6 : vector<8x128xi32>
    %8 = vector.extract_strided_slice %0 {offsets = [0, 1], sizes = [8, 1], strides = [1, 1]} : vector<8x8xf32> to vector<8x1xf32>
    %9 = arith.fptosi %8 : vector<8x1xf32> to vector<8x1xi32>
    %c5_i32 = arith.constant 5 : i32
    %10 = vector.broadcast %c5_i32 : i32 to vector<8x1xi32>
    %11 = arith.addi %9, %10 : vector<8x1xi32>
    %12 = vector.broadcast %11 : vector<8x1xi32> to vector<8x128xi32>
    %13 = arith.cmpi eq, %1, %12 : vector<8x128xi32>
    %14 = arith.ori %7, %13 : vector<8x128xi1>
    %15 = vector.extract_strided_slice %0 {offsets = [0, 2], sizes = [8, 1], strides = [1, 1]} : vector<8x8xf32> to vector<8x1xf32>
    %16 = arith.fptosi %15 : vector<8x1xf32> to vector<8x1xi32>
    %c12_i32 = arith.constant 12 : i32
    %17 = vector.broadcast %c12_i32 : i32 to vector<8x1xi32>
    %18 = arith.addi %16, %17 : vector<8x1xi32>
    %19 = vector.broadcast %18 : vector<8x1xi32> to vector<8x128xi32>
    %20 = arith.cmpi eq, %1, %19 : vector<8x128xi32>
    %21 = arith.ori %14, %20 : vector<8x128xi1>
    %22 = arith.extui %21 : vector<8x128xi1> to vector<8x128xi32>
    %23 = arith.sitofp %22 : vector<8x128xi32> to vector<8x128xf32>
    %c16_i32 = arith.constant 16 : i32
    %24 = vector.broadcast %c16_i32 : i32 to vector<8x128xi32>
    %25 = arith.cmpi eq, %1, %24 : vector<8x128xi32>
    %26 = vector.extract_strided_slice %0 {offsets = [0, 3], sizes = [8, 1], strides = [1, 1]} : vector<8x8xf32> to vector<8x1xf32>
    %27 = vector.shape_cast %26 : vector<8x1xf32> to vector<8x1xf32>
    %28 = vector.broadcast %27 : vector<8x1xf32> to vector<8x128xf32>
    %29 = arith.select %25, %28, %23 : vector<8x128xi1>, vector<8x128xf32>
    %c17_i32 = arith.constant 17 : i32
    %30 = vector.broadcast %c17_i32 : i32 to vector<8x128xi32>
    %31 = arith.cmpi eq, %1, %30 : vector<8x128xi32>
    %32 = vector.extract_strided_slice %0 {offsets = [0, 4], sizes = [8, 1], strides = [1, 1]} : vector<8x8xf32> to vector<8x1xf32>
    %33 = vector.shape_cast %32 : vector<8x1xf32> to vector<8x1xf32>
    %34 = vector.broadcast %33 : vector<8x1xf32> to vector<8x128xf32>
    %35 = arith.select %31, %34, %29 : vector<8x128xi1>, vector<8x128xf32>
    %c18_i32 = arith.constant 18 : i32
    %36 = vector.broadcast %c18_i32 : i32 to vector<8x128xi32>
    %37 = arith.cmpi eq, %1, %36 : vector<8x128xi32>
    %38 = vector.extract_strided_slice %0 {offsets = [0, 5], sizes = [8, 1], strides = [1, 1]} : vector<8x8xf32> to vector<8x1xf32>
    %39 = vector.shape_cast %38 : vector<8x1xf32> to vector<8x1xf32>
    %40 = vector.broadcast %39 : vector<8x1xf32> to vector<8x128xf32>
    %41 = arith.select %37, %40, %35 : vector<8x128xi1>, vector<8x128xf32>
    %c19_i32 = arith.constant 19 : i32
    %42 = vector.broadcast %c19_i32 : i32 to vector<8x128xi32>
    %43 = arith.cmpi eq, %1, %42 : vector<8x128xi32>
    %44 = vector.extract_strided_slice %0 {offsets = [0, 6], sizes = [8, 1], strides = [1, 1]} : vector<8x8xf32> to vector<8x1xf32>
    %45 = vector.shape_cast %44 : vector<8x1xf32> to vector<8x1xf32>
    %46 = vector.broadcast %45 : vector<8x1xf32> to vector<8x128xf32>
    %47 = arith.select %43, %46, %41 : vector<8x128xi1>, vector<8x128xf32>
    %c20_i32 = arith.constant 20 : i32
    %48 = vector.broadcast %c20_i32 : i32 to vector<8x128xi32>
    %49 = arith.cmpi eq, %1, %48 : vector<8x128xi32>
    %50 = vector.extract_strided_slice %0 {offsets = [0, 7], sizes = [8, 1], strides = [1, 1]} : vector<8x8xf32> to vector<8x1xf32>
    %51 = vector.shape_cast %50 : vector<8x1xf32> to vector<8x1xf32>
    %52 = vector.broadcast %51 : vector<8x1xf32> to vector<8x128xf32>
    %53 = arith.select %49, %52, %47 : vector<8x128xi1>, vector<8x128xf32>
    %54 = arith.truncf %53 : vector<8x128xf32> to vector<8x128xbf16>
    %c0_1 = arith.constant 0 : index
    %c0_2 = arith.constant 0 : index
    %55 = vector.load %arg2[%c0_1, %c0_2] : memref<128x128xbf16, #tpu.memory_space<vmem>>, vector<128x128xbf16>
    %cst = arith.constant dense<0.000000e+00> : vector<8x128xf32>
    %56 = tpu.matmul %54, %55, %cst {dimension_numbers = #tpu.dot_dimension_numbers<[1], [0], [0], [1], [0, 0, 1, 1], [], []>} : vector<8x128xbf16>, vector<128x128xbf16>, vector<8x128xf32> -> vector<8x128xf32>
    %c0_3 = arith.constant 0 : index
    %c0_4 = arith.constant 0 : index
    %57 = vector.load %arg3[%c0_3, %c0_4] : memref<1x128xf32, #tpu.memory_space<vmem>>, vector<1x128xf32>
    %58 = vector.broadcast %57 : vector<1x128xf32> to vector<8x128xf32>
    %59 = arith.addf %56, %58 : vector<8x128xf32>
    %cst_5 = arith.constant 0.000000e+00 : f32
    %60 = vector.broadcast %cst_5 : f32 to vector<8x128xf32>
    %61 = arith.maximumf %59, %60 : vector<8x128xf32>
    %62 = arith.truncf %61 : vector<8x128xf32> to vector<8x128xbf16>
    %c0_6 = arith.constant 0 : index
    %c0_7 = arith.constant 0 : index
    %63 = vector.load %arg4[%c0_6, %c0_7] : memref<128x128xbf16, #tpu.memory_space<vmem>>, vector<128x128xbf16>
    %cst_8 = arith.constant dense<0.000000e+00> : vector<8x128xf32>
    %64 = tpu.matmul %62, %63, %cst_8 {dimension_numbers = #tpu.dot_dimension_numbers<[1], [0], [0], [1], [0, 0, 1, 1], [], []>} : vector<8x128xbf16>, vector<128x128xbf16>, vector<8x128xf32> -> vector<8x128xf32>
    %c0_9 = arith.constant 0 : index
    %c0_10 = arith.constant 0 : index
    %65 = vector.load %arg5[%c0_9, %c0_10] : memref<1x128xf32, #tpu.memory_space<vmem>>, vector<1x128xf32>
    %66 = vector.broadcast %65 : vector<1x128xf32> to vector<8x128xf32>
    %67 = arith.addf %64, %66 : vector<8x128xf32>
    %cst_11 = arith.constant 0.000000e+00 : f32
    %68 = vector.broadcast %cst_11 : f32 to vector<8x128xf32>
    %69 = arith.maximumf %67, %68 : vector<8x128xf32>
    %70 = arith.truncf %69 : vector<8x128xf32> to vector<8x128xbf16>
    %c0_12 = arith.constant 0 : index
    %c0_13 = arith.constant 0 : index
    %71 = vector.load %arg6[%c0_12, %c0_13] : memref<128x128xbf16, #tpu.memory_space<vmem>>, vector<128x128xbf16>
    %cst_14 = arith.constant dense<0.000000e+00> : vector<8x128xf32>
    %72 = tpu.matmul %70, %71, %cst_14 {dimension_numbers = #tpu.dot_dimension_numbers<[1], [0], [0], [1], [0, 0, 1, 1], [], []>} : vector<8x128xbf16>, vector<128x128xbf16>, vector<8x128xf32> -> vector<8x128xf32>
    %c0_15 = arith.constant 0 : index
    %c0_16 = arith.constant 0 : index
    %73 = vector.load %arg7[%c0_15, %c0_16] : memref<1x128xf32, #tpu.memory_space<vmem>>, vector<1x128xf32>
    %74 = vector.broadcast %73 : vector<1x128xf32> to vector<8x128xf32>
    %75 = arith.addf %72, %74 : vector<8x128xf32>
    %76 = vector.extract_strided_slice %75 {offsets = [0, 0], sizes = [8, 20], strides = [1, 1]} : vector<8x128xf32> to vector<8x20xf32>
    %c0_17 = arith.constant 0 : index
    %c0_18 = arith.constant 0 : index
    %77 = vector.load %arg8[%c0_17, %c0_18] : memref<8x20xf32, #tpu.memory_space<vmem>>, vector<8x20xf32>
    tpu.vector_store %arg8[%c0_17, %c0_18], %76 {strides = array<i32>} : memref<8x20xf32, #tpu.memory_space<vmem>>, vector<8x20xf32>,
    return
  }
  func.func @transform_0(%arg0: i32) -> (i32, i32) {
    %c0_i32 = arith.constant 0 : i32
    %c0_i32_0 = arith.constant 0 : i32
    return %arg0, %c0_i32 : i32, i32
  }
  func.func @transform_1(%arg0: i32) -> (i32, i32) {
    %c0_i32 = arith.constant 0 : i32
    %c0_i32_0 = arith.constant 0 : i32
    %c0_i32_1 = arith.constant 0 : i32
    return %c0_i32, %c0_i32_0 : i32, i32
  }
  func.func @transform_2(%arg0: i32) -> (i32, i32) {
    %c0_i32 = arith.constant 0 : i32
    %c0_i32_0 = arith.constant 0 : i32
    %c0_i32_1 = arith.constant 0 : i32
    return %c0_i32, %c0_i32_0 : i32, i32
  }
  func.func @transform_3(%arg0: i32) -> (i32, i32) {
    %c0_i32 = arith.constant 0 : i32
    %c0_i32_0 = arith.constant 0 : i32
    %c0_i32_1 = arith.constant 0 : i32
    return %c0_i32, %c0_i32_0 : i32, i32
  }
  func.func @transform_4(%arg0: i32) -> (i32, i32) {
    %c0_i32 = arith.constant 0 : i32
    %c0_i32_0 = arith.constant 0 : i32
    %c0_i32_1 = arith.constant 0 : i32
    return %c0_i32, %c0_i32_0 : i32, i32
  }
  func.func @transform_5(%arg0: i32) -> (i32, i32) {
    %c0_i32 = arith.constant 0 : i32
    %c0_i32_0 = arith.constant 0 : i32
    %c0_i32_1 = arith.constant 0 : i32
    return %c0_i32, %c0_i32_0 : i32, i32
  }
  func.func @transform_6(%arg0: i32) -> (i32, i32) {
    %c0_i32 = arith.constant 0 : i32
    %c0_i32_0 = arith.constant 0 : i32
    %c0_i32_1 = arith.constant 0 : i32
    return %c0_i32, %c0_i32_0 : i32, i32
  }
  func.func @transform_7(%arg0: i32) -> (i32, i32) {
    %c0_i32 = arith.constant 0 : i32
    %c0_i32_0 = arith.constant 0 : i32
    return %arg0, %c0_i32 : i32, i32
  }
}

</mosaic_0001>

<bundles_post_ra>
// kernel: tpu_custom_call.1
= control target key start
LH: loop header
LB: loop body
LE: loop exit
PB: predicated region body
PF: predicated region fallthrough
CT: control target
= control target key end

     0   :  { %12 = vsyncpa [#allocation3], 0  ;;  %s942_s0 = inlined_call_operand.hbm [shape: f32[8,8], index: 0, kind: input, shape index: {}]   ;;  %s943_s1 = inlined_call_operand.hbm [shape: bf16[128,128], index: 1, kind: input, shape index: {}]   ;;  %s944_s2 = inlined_call_operand.vmem [shape: f32[1,128], index: 2, kind: input, shape index: {}]   ;;  %s945_s3 = inlined_call_operand.hbm [shape: bf16[128,128], index: 3, kind: input, shape index: {}]   ;;  %s946_s4 = inlined_call_operand.vmem [shape: f32[1,128], index: 4, kind: input, shape index: {}]   ;;  %s947_s5 = inlined_call_operand.hbm [shape: bf16[128,128], index: 5, kind: input, shape index: {}]   ;;  %s948_s6 = inlined_call_operand.vmem [shape: f32[1,128], index: 6, kind: input, shape index: {}]   ;;  %s949_s7 = inlined_call_operand.hbm [shape: f32[8,20], index: 7, kind: output, shape index: {}]  }
   0x1   :  { %13 = vsyncpa [#allocation6], 0 }
   0x2   :  { %14 = vsyncpa [#allocation9], 0 }
   0x3   :  { %15 = vsyncpa [#allocation4], 0  ;;  %s776_s24 = smov [#allocation5]   ;;  %s658_s28 = scalar_lea.hbm %s943_s1, 1024 }
   0x4   :  { %s31_s25 = sshll.u32 %s776_s24, 4  ;;  %p659_p0 = scmp.ne.s32.totalorder %s943_s1, %s658_s28  ;;  %s32_s25 = int_to_ptr.vmem [resolvable:$true] %s31_s25 }
   0x5   :  { %p662_p1 = scmp.lt.u32.totalorder %s658_s28, %s943_s1 }
   0x7   :  { %p664_p2 = pnand %p662_p1, %p659_p0 }
   0x9   :  { %667 = shalt.err (!%p664_p2)
}
   0xa   :  { %s668_s10 = scalar_lea.vmem %s32_s25, 1024  ;;  %p673_p4 = scmp.lt.s32.totalorder %s32_s25, %s32_s25 }
   0xb   :  { %p669_p3 = scmp.ne.s32.totalorder %s32_s25, %s668_s10  ;;  %p674_p5 = scmp.lt.s32.totalorder %s668_s10, %s668_s10 }
   0xd   :  { %p675_p6 = por %p674_p5, %p673_p4 }
   0xf   :  { %p676_p7 = pnand %p675_p6, %p669_p3 }
  0x11   :  { %679 = shalt.err (!%p676_p7)
}
  0x12   :  { %s777_s11 = smov 64   ;;  %s778_s12 = smov 4  }
  0x13   :  { %37 = dma.hbm_to_vmem [thread:$0]  %s943_s1, 1024, %s32_s25, [#allocation6], %s777_s11, %s777_s11, %s778_s12  }
  0x14   :  { %s779_s15 = smov [#allocation2]   ;;  %s780_s17 = smov [#allocation7]  }
  0x15   :  { %s22_s16 = sshll.u32 %s779_s15, 4  ;;  %s45_s18 = sshll.u32 %s780_s17, 4  ;;  %s23_s16 = int_to_ptr.vmem [resolvable:$true] %s22_s16  ;;  %s46_s18 = int_to_ptr.vmem [resolvable:$true] %s45_s18 }
  0x16   :  { %s680_s21 = scalar_lea.hbm %s942_s0, 128 }
  0x17   :  { %p681_p8 = scmp.ne.s32.totalorder %s942_s0, %s680_s21  ;;  %p684_p9 = scmp.lt.u32.totalorder %s680_s21, %s942_s0 }
  0x19   :  { %p686_p10 = pnand %p684_p9, %p681_p8 }
  0x1b   :  { %689 = shalt.err (!%p686_p10)
}
  0x1c   :  { %s690_s1 = scalar_lea.vmem %s23_s16, 128  ;;  %p695_p12 = scmp.lt.s32.totalorder %s23_s16, %s23_s16 }
  0x1d   :  { %p691_p11 = scmp.ne.s32.totalorder %s23_s16, %s690_s1  ;;  %p696_p13 = scmp.lt.s32.totalorder %s690_s1, %s690_s1 }
  0x1f   :  { %p697_p0 = por %p696_p13, %p695_p12 }
  0x21   :  { %p698_p1 = pnand %p697_p0, %p691_p11 }
  0x23   :  { %701 = shalt.err (!%p698_p1)
}
  0x24   :  { %25 = dma.hbm_to_vmem [thread:$0]  %s942_s0, 128, %s23_s16, [#allocation3]  }
  0x25   :  { %s702_s30 = scalar_lea.hbm %s945_s3, 1024 }
  0x26   :  { %p703_p2 = scmp.ne.s32.totalorder %s945_s3, %s702_s30  ;;  %p706_p3 = scmp.lt.u32.totalorder %s702_s30, %s945_s3 }
  0x28   :  { %p708_p4 = pnand %p706_p3, %p703_p2 }
  0x2a   :  { %711 = shalt.err (!%p708_p4)
}
  0x2b   :  { %s712_s14 = scalar_lea.vmem %s46_s18, 1024  ;;  %p717_p6 = scmp.lt.s32.totalorder %s46_s18, %s46_s18 }
  0x2c   :  { %p713_p5 = scmp.ne.s32.totalorder %s46_s18, %s712_s14  ;;  %p718_p7 = scmp.lt.s32.totalorder %s712_s14, %s712_s14 }
  0x2e   :  { %p719_p8 = por %p718_p7, %p717_p6 }
  0x30   :  { %p720_p9 = pnand %p719_p8, %p713_p5 }
  0x32   :  { %723 = shalt.err (!%p720_p9)
}
  0x33   :  { %51 = dma.hbm_to_vmem [thread:$0]  %s945_s3, 1024, %s46_s18, [#allocation6], %s777_s11, %s777_s11, %s778_s12  }
  0x34   :  { %s781_s16 = smov [#allocation8]   ;;  %s724_s21 = scalar_lea.hbm %s947_s5, 1024 }
  0x35   :  { %s59_s17 = sshll.u32 %s781_s16, 4  ;;  %p725_p10 = scmp.ne.s32.totalorder %s947_s5, %s724_s21  ;;  %s60_s17 = int_to_ptr.vmem [resolvable:$true] %s59_s17 }
  0x36   :  { %p728_p11 = scmp.lt.u32.totalorder %s724_s21, %s947_s5 }
  0x38   :  { %p730_p12 = pnand %p728_p11, %p725_p10 }
  0x3a   :  { %733 = shalt.err (!%p730_p12)
}
  0x3b   :  { %s734_s1 = scalar_lea.vmem %s60_s17, 1024  ;;  %p739_p0 = scmp.lt.s32.totalorder %s60_s17, %s60_s17 }
  0x3c   :  { %p735_p13 = scmp.ne.s32.totalorder %s60_s17, %s734_s1  ;;  %p740_p1 = scmp.lt.s32.totalorder %s734_s1, %s734_s1 }
  0x3e   :  { %p741_p2 = por %p740_p1, %p739_p0 }
  0x40   :  { %p742_p3 = pnand %p741_p2, %p735_p13 }
  0x42   :  { %745 = shalt.err (!%p742_p3)
}
  0x43   :  { %65 = dma.hbm_to_vmem [thread:$0]  %s947_s5, 1024, %s60_s17, [#allocation9], %s777_s11, %s777_s11, %s778_s12  }
  0x44   :  { %768 = dma.done.wait [#allocation3], 128  }
  0x45   :  { %769 = vsyncadd [#allocation3], 4294967168 }
  0x46   :  { %770 = dma.done.wait [#allocation6], 2048  }
  0x47   :  { %771 = vsyncadd [#allocation6], 4294965248 }
  0x48   :  { %772 = dma.done.wait [#allocation9], 1024  }
  0x49   :  { %773 = vsyncadd [#allocation9], 4294966272  ;;  %v782_v0 = vmov 3   ;;  %v783_v1 = vmov 0   ;;  %v784_v2 = vmov 0.0   ;;  %v81_v3 = vld [vmem:[#allocation2] sm:$0xff]  ;;  %v82_v29 = vlaneseq }
  0x4a   :  { %625 = vset.pattern.permute.xlu1 %v782_v0  ;;  %627 = vset.pattern.permute.xlu0 %v783_v1  ;;  %v606_v4 = vtrunc.f32 %v81_v3  ;;  %v634_v5 = vld [vmem:[#allocation5] sm:$0xff]   ;;  %v635_v7 = vld [vmem:[#allocation5 + $0x8] sm:$0xff]   ;;  %v785_v8 = vmov 4   ;;  %v636_v9 = vld [vmem:[#allocation5 + $0x10] sm:$0xff]   ;;  %v786_v12 = vmov 1   ;;  %v787_v13 = vmov 2  }
  0x4b   :  { %546 = vmatprep.subr.bf16.mxu0 %v784_v2  ;;  %566 = vmatprep.subr.bf16.mxu1 %v784_v2  ;;  %v637_v14 = vld [vmem:[#allocation5 + $0x18] sm:$0xff]   ;;  %v788_v15 = vmov 5   ;;  %v789_v16 = vmov 6   ;;  %v638_v17 = vld [vmem:[#allocation5 + $0x20] sm:$0xff]   ;;  %v790_v18 = vmov 7   ;;  %v639_v19 = vld [vmem:[#allocation5 + $0x28] sm:$0xff]  }
  0x4c   :  { %106 = vperm.xlu1 %625, %v81_v3   ;;  %v607_v6 = vcvt.f32.s32 %v606_v4  ;;  %547 = vmatpush3.bf16.msra.mxu0 %v634_v5  ;;  %vm791_vm0 = vmmov 0   ;;  %v640_v20 = vld [vmem:[#allocation5 + $0x30] sm:$0xff]   ;;  %v642_v21 = vld [vmem:[#allocation7] sm:$0xff]   ;;  %v643_v22 = vld [vmem:[#allocation7 + $0x8] sm:$0xff]   ;;  %v83_v32 = vand.u32 127, %v82_v29  ;;  %s792_s28 = smov [#allocation10]  }
  0x4d   :  { %548 = vmatprep.subr.bf16.mxu0 %v784_v2  ;;  %562 = vmatprep.mubr.msk.bf16.mxu0 %vm791_vm0, %v784_v2  ;;  %v641_v23 = vld [vmem:[#allocation5 + $0x38] sm:$0xff]   ;;  %v644_v24 = vld [vmem:[#allocation7 + $0x10] sm:$0xff]   ;;  %v646_v26 = vld [vmem:[#allocation7 + $0x20] sm:$0xff]   ;;  %s480_s29 = sshll.u32 %s792_s28, 4  ;;  %vm472_vm11 = vcmask 162816   ;;  %s481_s29 = int_to_ptr.vmem [resolvable:$true] %s480_s29 }
  0x4e   :  { %86 = vperm.xlu0 %627, %v607_v6   ;;  %v89_v10 = vadd.s32 5, %v607_v6  ;;  %v95_v11 = vadd.s32 12, %v607_v6  ;;  %582 = vmatprep.mubr.msk.bf16.mxu1 %vm791_vm0, %v784_v2  ;;  %v645_v25 = vld [vmem:[#allocation7 + $0x18] sm:$0xff]   ;;  %v647_v27 = vld [vmem:[#allocation7 + $0x28] sm:$0xff]   ;;  %vm103_vm4 = vcmp.eq.s32.totalorder %v83_v32, 16  ;;  %vm110_vm7 = vcmp.eq.s32.totalorder %v83_v32, 17  ;;  %p751_p5 = scmp.lt.s32.totalorder %s481_s29, %s481_s29 }
  0x4f   :  { %567 = vmatpush3.bf16.msra.mxu1 %v642_v21  ;;  %vm116_vm8 = vcmp.eq.s32.totalorder %v83_v32, 18  ;;  %vm122_vm9 = vcmp.eq.s32.totalorder %v83_v32, 19  ;;  %vm128_vm10 = vcmp.eq.s32.totalorder %v83_v32, 20  ;;  %v648_v45 = vld [vmem:[#allocation7 + $0x30] sm:$0xff]   ;;  %v649_v46 = vld [vmem:[#allocation7 + $0x38] sm:$0xff]   ;;  %v650_v47 = vld [vmem:[#allocation8] sm:$0xff]  }
  0x50   :  { %626 = vset.pattern.permute.xlu1 %v785_v8  ;;  %549 = vmatpush3.bf16.msra.mxu0 %v635_v7  ;;  %v651_v48 = vld [vmem:[#allocation8 + $0x8] sm:$0xff]   ;;  %v652_v49 = vld [vmem:[#allocation8 + $0x10] sm:$0xff]   ;;  %v653_v50 = vld [vmem:[#allocation8 + $0x18] sm:$0xff]  }
  0x51   :  { %112 = vperm.xlu1 %626, %v81_v3   ;;  %550 = vmatprep.subr.bf16.mxu0 %v784_v2  ;;  %v654_v51 = vld [vmem:[#allocation8 + $0x20] sm:$0xff]   ;;  %v655_v52 = vld [vmem:[#allocation8 + $0x28] sm:$0xff]   ;;  %v492_v53 = vld [vmem:[%s944_s2] ss:$0 sm:$0xff] }
  0x52   :  { %628 = vset.pattern.permute.xlu0 %v786_v12  ;;  %568 = vmatprep.subr.bf16.mxu1 %v784_v2  ;;  %v656_v61 = vld [vmem:[#allocation8 + $0x30] sm:$0xff]   ;;  %v657_v62 = vld [vmem:[#allocation8 + $0x38] sm:$0xff]  }
  0x53   :  { %91 = vperm.xlu0 %628, %v89_v10   ;;  %569 = vmatpush3.bf16.msra.mxu1 %v643_v22  ;;  %v501_v63 = vld [vmem:[%s946_s4] ss:$0 sm:$0xff]  ;;  %s746_s4 = scalar_lea.vmem %s481_s29, 128 }
  0x54   :  { %551 = vmatpush3.bf16.msra.mxu0 %v636_v9  ;;  %570 = vmatprep.subr.bf16.mxu1 %v784_v2  ;;  %v510_v8 = vld [vmem:[%s948_s6] ss:$0 sm:$0xff]  ;;  %p747_p4 = scmp.ne.s32.totalorder %s481_s29, %s746_s4  ;;  %p752_p6 = scmp.lt.s32.totalorder %s746_s4, %s746_s4 }
  0x55   :  { %629 = vset.pattern.permute.xlu1 %v787_v13  ;;  %552 = vmatprep.subr.bf16.mxu0 %v784_v2 }
  0x56   :  { %97 = vperm.xlu1 %629, %v95_v11   ;;  %p753_p7 = por %p752_p6, %p751_p5 }
  0x57   :  { %630 = vset.pattern.permute.xlu0 %v788_v15  ;;  %571 = vmatpush3.bf16.msra.mxu1 %v644_v24 }
  0x58   :  { %118 = vperm.xlu0 %630, %v81_v3   ;;  %553 = vmatpush3.bf16.msra.mxu0 %v637_v14  ;;  %p754_p8 = pnand %p753_p7, %p747_p4 }
  0x59   :  { %554 = vmatprep.subr.bf16.mxu0 %v784_v2  ;;  %572 = vmatprep.subr.bf16.mxu1 %v784_v2 }
  0x5a   :  { %631 = vset.pattern.permute.xlu1 %v789_v16 }
  0x5b   :  { %124 = vperm.xlu1 %631, %v81_v3   ;;  %573 = vmatpush3.bf16.msra.mxu1 %v645_v25 }
  0x5c   :  { %633 = vset.pattern.permute.xlu0 %v790_v18  ;;  %555 = vmatpush3.bf16.msra.mxu0 %v638_v17 }
  0x5d   :  { %556 = vmatprep.subr.bf16.mxu0 %v784_v2  ;;  %574 = vmatprep.subr.bf16.mxu1 %v784_v2 }
  0x5f   :  { %632 = vset.pattern.permute.xlu1 %v790_v18  ;;  %575 = vmatpush3.bf16.msra.mxu1 %v646_v26 }
  0x60   :  { %130 = vperm.xlu1 %632, %v81_v3   ;;  %557 = vmatpush3.bf16.msra.mxu0 %v639_v19 }
  0x61   :  { %558 = vmatprep.subr.bf16.mxu0 %v784_v2  ;;  %576 = vmatprep.subr.bf16.mxu1 %v784_v2 }
  0x63   :  { %577 = vmatpush3.bf16.msra.mxu1 %v647_v27 }
  0x64   :  { %559 = vmatpush3.bf16.msra.mxu0 %v640_v20  ;;  %578 = vmatprep.subr.bf16.mxu1 %v784_v2 }
  0x65   :  { %560 = vmatprep.subr.bf16.mxu0 %v784_v2 }
  0x67   :  { %579 = vmatpush3.bf16.msra.mxu1 %v648_v45 }
  0x68   :  { %561 = vmatpush3.bf16.msra.mxu0 %v641_v23  ;;  %580 = vmatprep.subr.bf16.mxu1 %v784_v2 }
  0x69   :  { %586 = vmatprep.subr.bf16.mxu0 %v784_v2 }
  0x6b   :  { %581 = vmatpush3.bf16.msra.mxu1 %v649_v46 }
  0xcb   :  { %v107_v28 = vpop.permute.xlu1 %106 }
  0xcd   :  { %v87_v30 = vpop.permute.xlu0 %86 }
  0xce   :  { %vm88_vm1 = vcmp.eq.s32.totalorder %v83_v32, %v87_v30 }
  0xd0   :  { %v113_v31 = vpop.permute.xlu1 %112 }
  0xd2   :  { %v92_v33 = vpop.permute.xlu0 %91 }
  0xd3   :  { %vm93_vm2 = vcmp.eq.s32.totalorder %v83_v32, %v92_v33 }
  0xd4   :  { %vm94_vm3 = vmor %vm88_vm1, %vm93_vm2 }
  0xd5   :  { %v98_v34 = vpop.permute.xlu1 %97 }
  0xd6   :  { %vm99_vm5 = vcmp.eq.s32.totalorder %v83_v32, %v98_v34 }
  0xd7   :  { %vm100_vm6 = vmor %vm94_vm3, %vm99_vm5  ;;  %v119_v37 = vpop.permute.xlu0 %118 }
  0xd8   :  { %v491_v35 = vsel %vm100_vm6, 1.0, %v784_v2 }
  0xd9   :  { %v109_v36 = vsel %vm103_vm4, %v107_v28, %v491_v35 }
  0xda   :  { %v125_v38 = vpop.permute.xlu1 %124  ;;  %v115_v39 = vsel %vm110_vm7, %v113_v31, %v109_v36 }
  0xdb   :  { %v121_v40 = vsel %vm116_vm8, %v119_v37, %v115_v39 }
  0xdc   :  { %v127_v42 = vsel %vm122_vm9, %v125_v38, %v121_v40 }
  0xdf   :  { %v131_v41 = vpop.permute.xlu1 %130 }
  0xe0   :  { %v133_v43 = vsel %vm128_vm10, %v131_v41, %v127_v42 }
  0xe1   :  { %v134_v44 = vpack.c.bf16 %v133_v43, %v133_v43 }
  0xe3   :  { %563 = vmatmul.mubr.bf16.vlgmr.msra.gmra.mrb[0].mxu0 %v134_v44 }
  0xe4   :  { %602 = vmatprep.mubr.msk.bf16.mxu0 %vm791_vm0, %v784_v2  ;;  %587 = vmatpush3.bf16.msra.mxu0 %v650_v47 }
  0xe5   :  { %588 = vmatprep.subr.bf16.mxu0 %v784_v2 }
  0xe8   :  { %589 = vmatpush3.bf16.msra.mxu0 %v651_v48 }
  0xe9   :  { %590 = vmatprep.subr.bf16.mxu0 %v784_v2 }
  0xec   :  { %591 = vmatpush3.bf16.msra.mxu0 %v652_v49 }
  0xed   :  { %592 = vmatprep.subr.bf16.mxu0 %v784_v2 }
  0xf0   :  { %593 = vmatpush3.bf16.msra.mxu0 %v653_v50 }
  0xf1   :  { %594 = vmatprep.subr.bf16.mxu0 %v784_v2 }
  0xf4   :  { %595 = vmatpush3.bf16.msra.mxu0 %v654_v51 }
  0xf5   :  { %596 = vmatprep.subr.bf16.mxu0 %v784_v2 }
  0xf8   :  { %597 = vmatpush3.bf16.msra.mxu0 %v655_v52 }
  0xf9   :  { %598 = vmatprep.subr.bf16.mxu0 %v784_v2 }
  0xfc   :  { %599 = vmatpush3.bf16.msra.mxu0 %v656_v61 }
  0xfd   :  { %600 = vmatprep.subr.bf16.mxu0 %v784_v2 }
 0x100   :  { %601 = vmatpush3.bf16.msra.mxu0 %v657_v62 }
 0x1b6   :  { %v240_v54 = vpop.f32.mrb[0].mxu0 }
 0x1b7   :  { %v241_v55 = vadd.f32 %v492_v53, %v240_v54  ;;  %v564_v56 = vpop.f32.mrb[1].mxu0 }
 0x1b8   :  { %v243_v57 = vpop.f32.mrb[2].mxu0 }
 0x1b9   :  { %v246_v58 = vmax.f32 %v241_v55, 0.0  ;;  %v565_v59 = vpop.f32.mrb[3].mxu0 }
 0x1bb   :  { %v247_v60 = vpack.c.bf16 %v246_v58, %v246_v58 }
 0x1bd   :  { %583 = vmatmul.mubr.bf16.vlgmr.msra.gmra.mrb[0].mxu1 %v247_v60 }
 0x290   :  { %v353_v0 = vpop.f32.mrb[0].mxu1 }
 0x291   :  { %v354_v1 = vadd.f32 %v501_v63, %v353_v0  ;;  %v584_v3 = vpop.f32.mrb[1].mxu1 }
 0x292   :  { %v356_v4 = vpop.f32.mrb[2].mxu1 }
 0x293   :  { %v359_v5 = vmax.f32 %v354_v1, 0.0  ;;  %v585_v6 = vpop.f32.mrb[3].mxu1 }
 0x295   :  { %v360_v7 = vpack.c.bf16 %v359_v5, %v359_v5 }
 0x297   :  { %603 = vmatmul.mubr.bf16.vlgmr.msra.gmra.mrb[4].mxu0 %v360_v7 }
 0x36a   :  { %v466_v2 = vpop.f32.mrb[4].mxu0 }
 0x36b   :  { %v467_v9 = vadd.f32 %v510_v8, %v466_v2  ;;  %v604_v10 = vpop.f32.mrb[5].mxu0 }
 0x36c   :  { %v469_v11 = vpop.f32.mrb[6].mxu0 }
 0x36d   :  { %v605_v12 = vpop.f32.mrb[7].mxu0  ;;  %473 = vst.msk [vmem:[#allocation10] sm:$0xff] %vm472_vm11, %v467_v9 }
 0x36e   :  { %757 = shalt.err (!%p754_p8)
}
 0x36f   :  { %s758_s6 = scalar_lea.hbm %s949_s7, 128 }
 0x370   :  { %p759_p9 = scmp.ne.s32.totalorder %s949_s7, %s758_s6  ;;  %p762_p10 = scmp.lt.u32.totalorder %s758_s6, %s949_s7 }
 0x372   :  { %p764_p11 = pnand %p762_p10, %p759_p9 }
 0x374   :  { %767 = shalt.err (!%p764_p11)
}
 0x375   :  { %483 = dma.vmem_to_hbm [thread:$0]  %s481_s29, 128, %s949_s7, [#allocation4]  }
 0x376   :  { %774 = dma.done.wait [#allocation4], 128  }
 0x377   :  { %775 = vsyncadd [#allocation4], 4294967168 }
 0x378   :  { %487 = vsyncpa [#allocation3], 1 }
 0x379   :  { %488 = vsyncpa [#allocation6], 1 }
 0x37a   :  { %489 = vsyncpa [#allocation9], 1 }
 0x37b   :  { %490 = vsyncpa [#allocation4], 1 }

</bundles_post_ra>
